<compile_context>
chip_gen: v6e
topology: v6e:2x2x1
jax: 0.10.0
libtpu: 0.0.40
codegen_flags: <defaults>
</compile_context>

<pallas_src>
import functools
import math

import jax
import jax.numpy as jnp
from jax.experimental import pallas as pl
from jax.experimental.pallas import tpu as pltpu


def _round_up(x, m):
    return (x + m - 1) // m * m


def _vmem_budget_bytes():
    """Per-TensorCore VMEM capacity minus headroom for Mosaic scratch/semaphores."""
    cap = 64 * 1024 * 1024  # conservative fallback (v7x per-TC)
    try:
        info = pltpu.get_tpu_info()
        for name in ("vmem_capacity_bytes", "vmem_bytes", "vmem_size_bytes"):
            v = getattr(info, name, None)
            if v:
                cap = int(v)
                break
    except Exception:
        pass
    headroom = max(cap // 8, 12 * 1024 * 1024)  # ~12 MiB on 64 MiB, 16 MiB on 128 MiB
    return cap - headroom


def _choose_q_tile(Lq, target):
    """Largest divisor of Lq that is a multiple of 8 and <= target, else Lq itself."""
    best = None
    upper = min(Lq, target)
    for cand in range(8, upper + 1, 8):
        if Lq % cand == 0:
            best = cand
    return best if best is not None else Lq


def _largest_divisor_leq(n, cap):
    cap = max(1, min(n, int(cap)))
    for d in range(cap, 0, -1):
        if n % d == 0:
            return d
    return 1


def _make_attn_kernel(inv_scale, Lk_valid, Lk_pad, use_bf16_matmul):
    def attn_kernel(q_ref, k_ref, v_ref, m_ref, ctx_ref, attn_ref):
        # q_ref: (T, tq, d_k), k_ref: (T, Lk_pad, d_k), v_ref: (T, Lk_pad, d_v_pad),
        # m_ref: (T, tq, Lk_pad) int8 (nonzero = masked out)

        # Fold 1/sqrt(d_k) into Q (touches tq*d_k elements, not tq*Lk scores).
        q = q_ref[...] * jnp.float32(inv_scale)
        k = k_ref[...]
        if use_bf16_matmul:
            q = q.astype(jnp.bfloat16)
            k = k.astype(jnp.bfloat16)

        # scores[b, q, k] = sum_d Q[b, q, d] * K[b, k, d]; K-transpose expressed
        # via dimension_numbers so the MXU consumes K directly.
        scores = jax.lax.dot_general(
            q, k,
            dimension_numbers=(((2,), (2,)), ((0,), (0,))),
            preferred_element_type=jnp.float32,
        )  # (T, tq, Lk_pad) f32

        # masked_fill_(attn_mask, -1e9)
        scores = jnp.where(m_ref[...] != 0, jnp.float32(-1.0e9), scores)

        # Neutralize lane-padding key columns *before* the row max so that
        # fully-masked rows still produce the reference's uniform 1/Lk.
        if Lk_pad != Lk_valid:
            col = jax.lax.broadcasted_iota(jnp.int32, scores.shape, 2)
            scores = jnp.where(col >= Lk_valid, jnp.float32(-1.0e30), scores)

        # Numerically stable softmax along the key axis.
        row_max = jnp.max(scores, axis=-1, keepdims=True)
        exps = jnp.exp(scores - row_max)
        denom = jnp.sum(exps, axis=-1, keepdims=True)
        # EUP approx reciprocal + one Newton-Raphson step (keeps ~f32 accuracy
        # while leaving the VALU free in the softmax epilogue).
        inv = pl.reciprocal(denom, approx=True)
        inv = inv * (jnp.float32(2.0) - denom * inv)
        attn = exps * inv

        p = attn
        v = v_ref[...]
        if use_bf16_matmul:
            p = p.astype(jnp.bfloat16)
            v = v.astype(jnp.bfloat16)

        # context[b, q, d] = sum_k attn[b, q, k] * V[b, k, d]
        ctx = jax.lax.dot_general(
            p, v,
            dimension_numbers=(((2,), (1,)), ((0,), (0,))),
            preferred_element_type=jnp.float32,
        )  # (T, tq, d_v_pad)

        ctx_ref[...] = ctx.astype(ctx_ref.dtype)
        attn_ref[...] = attn.astype(attn_ref.dtype)

    return attn_kernel


@functools.partial(
    jax.jit, static_argnames=("d_k", "use_bf16_matmul", "attn_out_dtype"))
def scaled_dot_product_attention(Q, K, V, attn_mask, *, d_k=None,
                                 use_bf16_matmul=False,
                                 attn_out_dtype=jnp.float32):
    """
    Q: [B, H, Lq, d_k] f32
    K: [B, H, Lk, d_k] f32
    V: [B, H, Lk, d_v] f32
    attn_mask: [B, H, Lq, Lk] bool (True = mask out)
    Returns: (context [B, H, Lq, d_v] f32, attn [B, H, Lq, Lk] attn_out_dtype)
    """
    B, H, Lq, dk = Q.shape
    Lk = K.shape[2]
    dv = V.shape[3]
    BH = B * H
    if d_k is None:
        d_k = dk  # derive the scale from Q's actual head dim
    inv_scale = 1.0 / math.sqrt(float(d_k))

    # Lane-dense output last dims (full vst instead of masked vst.msk).
    Lk_pad = _round_up(max(Lk, 128), 128)
    dv_pad = _round_up(max(dv, 128), 128)
    attn_itemsize = jnp.dtype(attn_out_dtype).itemsize

    # --- VMEM-driven tiling ------------------------------------------------
    budget = _vmem_budget_bytes()

    def per_bh_bytes(tq):
        qb = tq * dk * 4
        kb = Lk_pad * dk * 4
        vb = Lk_pad * dv_pad * 4
        mb = tq * Lk_pad * 1          # int8 mask
        cb = tq * dv_pad * 4
        ab = tq * Lk_pad * attn_itemsize
        dbuf = 2 * (qb + kb + vb + mb + cb + ab)        # double-buffered blocks
        temps = 3 * tq * Lk_pad * 4                     # scores/exps/attn live f32
        return dbuf + temps

    tq_target = 256
    while True:
        tq = _choose_q_tile(Lq, tq_target)
        bh_max = budget // per_bh_bytes(tq)
        if bh_max >= 1 or tq_target <= 8:
            break
        tq_target //= 2
    bh_max = max(1, bh_max)

    # Divisor of BH (no jnp.pad of the big input streams).
    bh_tile = _largest_divisor_leq(BH, bh_max)
    num_q = Lq // tq
    # Ensure >= 2 grid steps (v7x megacore sharding + DMA/compute overlap).
    if (BH // bh_tile) * num_q < 2 and BH >= 2:
        bh_tile = _largest_divisor_leq(BH, max(1, BH // 2))
    num_bh = BH // bh_tile

    # --- Reshape / lane padding (only K/V/mask, and only when needed) ------
    q = Q.reshape(BH, Lq, dk)
    k = K.reshape(BH, Lk, dk)
    v = V.reshape(BH, Lk, dv)
    m = attn_mask.reshape(BH, Lq, Lk).astype(jnp.int8)  # 4x less DMA than int32

    if Lk_pad != Lk:
        k = jnp.pad(k, ((0, 0), (0, Lk_pad - Lk), (0, 0)))
        v = jnp.pad(v, ((0, 0), (0, Lk_pad - Lk), (0, 0)))
        m = jnp.pad(m, ((0, 0), (0, 0), (0, Lk_pad - Lk)))
    if dv_pad != dv:
        v = jnp.pad(v, ((0, 0), (0, 0), (0, dv_pad - dv)))

    kernel = _make_attn_kernel(inv_scale, Lk, Lk_pad, use_bf16_matmul)

    grid_spec = pltpu.PrefetchScalarGridSpec(
        num_scalar_prefetch=0,
        grid=(num_bh, num_q),
        in_specs=[
            pl.BlockSpec((bh_tile, tq, dk), lambda i, j: (i, j, 0)),
            # K/V index maps ignore the q axis -> blocks stay resident across j.
            pl.BlockSpec((bh_tile, Lk_pad, dk), lambda i, j: (i, 0, 0)),
            pl.BlockSpec((bh_tile, Lk_pad, dv_pad), lambda i, j: (i, 0, 0)),
            pl.BlockSpec((bh_tile, tq, Lk_pad), lambda i, j: (i, j, 0)),
        ],
        out_specs=[
            pl.BlockSpec((bh_tile, tq, dv_pad), lambda i, j: (i, j, 0)),
            pl.BlockSpec((bh_tile, tq, Lk_pad), lambda i, j: (i, j, 0)),
        ],
    )

    ctx_flat, attn_flat = pl.pallas_call(
        kernel,
        out_shape=(
            jax.ShapeDtypeStruct((BH, Lq, dv_pad), jnp.float32),
            jax.ShapeDtypeStruct((BH, Lq, Lk_pad), attn_out_dtype),
        ),
        grid_spec=grid_spec,
        compiler_params=pltpu.CompilerParams(
            dimension_semantics=("parallel", "parallel"),
            vmem_limit_bytes=int(budget),
        ),
    )(q, k, v, m)

    ctx = ctx_flat[:, :, :dv].reshape(B, H, Lq, dv)
    attn = attn_flat[:, :, :Lk].reshape(B, H, Lq, Lk)
    return ctx, attn


def reference_attention(Q, K, V, attn_mask, d_k):
    scale = jnp.sqrt(jnp.float32(d_k))
    scores = jnp.einsum("bhqd,bhkd->bhqk", Q, K) / scale
    scores = jnp.where(attn_mask, jnp.float32(-1.0e9), scores)
    attn = jax.nn.softmax(scores, axis=-1)
    ctx = jnp.einsum("bhqk,bhkd->bhqd", attn, V)
    return ctx, attn


if __name__ == "__main__":
    B, H, Lq, Lk, d_k, d_v = 2, 4, 8, 8, 32, 32

    key = jax.random.PRNGKey(0)
    kq, kk, kv, km = jax.random.split(key, 4)
    Q = jax.random.normal(kq, (B, H, Lq, d_k), dtype=jnp.float32)
    K = jax.random.normal(kk, (B, H, Lk, d_k), dtype=jnp.float32)
    V = jax.random.normal(kv, (B, H, Lk, d_v), dtype=jnp.float32)
    # Boolean mask: True = masked-out position (e.g., padding).
    attn_mask = jax.random.bernoulli(km, p=0.2, shape=(B, H, Lq, Lk))

    ctx, attn = scaled_dot_product_attention(Q, K, V, attn_mask)
    jax.block_until_ready((ctx, attn))

    ctx_ref, attn_ref = reference_attention(Q, K, V, attn_mask, d_k)
    assert jnp.allclose(ctx, ctx_ref, atol=2e-5, rtol=2e-5), "context mismatch"
    assert jnp.allclose(attn, attn_ref, atol=2e-5, rtol=2e-5), "attn mismatch"

    print("KERNEL_OK")
</pallas_src>

<mosaic_0001>
module attributes {stable_mosaic.version = 11 : i64} {
  func.func @attn_kernel(%arg0: i32, %arg1: i32, %arg2: memref<4x8x32xf32, #tpu.memory_space<vmem>>, %arg3: memref<4x128x32xf32, #tpu.memory_space<vmem>>, %arg4: memref<4x128x128xf32, #tpu.memory_space<vmem>>, %arg5: memref<4x8x128xi8, #tpu.memory_space<vmem>>, %arg6: memref<4x8x128xf32, #tpu.memory_space<vmem>>, %arg7: memref<4x8x128xf32, #tpu.memory_space<vmem>>) attributes {dimension_semantics = [#tpu.dimension_semantics<parallel>, #tpu.dimension_semantics<parallel>], iteration_bounds = array<i64: 2, 1>, scalar_prefetch = 0 : i64, scratch_operands = 0 : i64, tpu.core_type = #tpu.core_type<tc>, window_params = [{transform_indices = @transform_0, window_bounds = array<i64: 4, 8, 32>}, {transform_indices = @transform_1, window_bounds = array<i64: 4, 128, 32>}, {transform_indices = @transform_2, window_bounds = array<i64: 4, 128, 128>}, {transform_indices = @transform_3, window_bounds = array<i64: 4, 8, 128>}, {transform_indices = @transform_4, window_bounds = array<i64: 4, 8, 128>}, {transform_indices = @transform_5, window_bounds = array<i64: 4, 8, 128>}]} {
    %c0 = arith.constant 0 : index
    %c0_0 = arith.constant 0 : index
    %c0_1 = arith.constant 0 : index
    %0 = vector.load %arg2[%c0, %c0_0, %c0_1] : memref<4x8x32xf32, #tpu.memory_space<vmem>>, vector<4x8x32xf32>
    %cst = arith.constant 0.176776692 : f32
    %1 = vector.broadcast %cst : f32 to vector<4x8x32xf32>
    %2 = arith.mulf %0, %1 : vector<4x8x32xf32>
    %c0_2 = arith.constant 0 : index
    %c0_3 = arith.constant 0 : index
    %c0_4 = arith.constant 0 : index
    %3 = vector.load %arg3[%c0_2, %c0_3, %c0_4] : memref<4x128x32xf32, #tpu.memory_space<vmem>>, vector<4x128x32xf32>
    %cst_5 = arith.constant dense<0.000000e+00> : vector<4x8x128xf32>
    %4 = tpu.matmul %2, %3, %cst_5 {dimension_numbers = #tpu.dot_dimension_numbers<[2], [2], [1], [1], [0, 0, 0, 1, 1, 1], [0], [0]>} : vector<4x8x32xf32>, vector<4x128x32xf32>, vector<4x8x128xf32> -> vector<4x8x128xf32>
    %c0_6 = arith.constant 0 : index
    %c0_7 = arith.constant 0 : index
    %c0_8 = arith.constant 0 : index
    %5 = vector.load %arg5[%c0_6, %c0_7, %c0_8] : memref<4x8x128xi8, #tpu.memory_space<vmem>>, vector<4x8x128xi8>
    %c0_i8 = arith.constant 0 : i8
    %6 = vector.broadcast %c0_i8 : i8 to vector<4x8x128xi8>
    %7 = arith.cmpi ne, %5, %6 : vector<4x8x128xi8>
    %cst_9 = arith.constant -1.000000e+09 : f32
    %8 = vector.broadcast %cst_9 : f32 to vector<4x8x128xf32>
    %9 = arith.select %7, %8, %4 : vector<4x8x128xi1>, vector<4x8x128xf32>
    %10 = tpu.iota {dimensions = array<i32: 2>} : vector<4x8x128xi32>
    %c8_i32 = arith.constant 8 : i32
    %11 = vector.broadcast %c8_i32 : i32 to vector<4x8x128xi32>
    %12 = arith.cmpi sge, %10, %11 : vector<4x8x128xi32>
    %cst_10 = arith.constant -1.000000e+30 : f32
    %13 = vector.broadcast %cst_10 : f32 to vector<4x8x128xf32>
    %14 = arith.select %12, %13, %9 : vector<4x8x128xi1>, vector<4x8x128xf32>
    %cst_11 = arith.constant dense<0xFF800000> : vector<4x8xf32>
    %15 = vector.multi_reduction <maximumf>, %14, %cst_11 [2] : vector<4x8x128xf32> to vector<4x8xf32>
    %16 = vector.shape_cast %15 : vector<4x8xf32> to vector<4x8x1xf32>
    %17 = vector.broadcast %16 : vector<4x8x1xf32> to vector<4x8x128xf32>
    %18 = arith.subf %14, %17 : vector<4x8x128xf32>
    %19 = math.exp %18 : vector<4x8x128xf32>
    %cst_12 = arith.constant dense<0.000000e+00> : vector<4x8xf32>
    %20 = vector.multi_reduction <add>, %19, %cst_12 [2] : vector<4x8x128xf32> to vector<4x8xf32>
    %21 = vector.shape_cast %20 : vector<4x8xf32> to vector<4x8x1xf32>
    %22 = tpu.reciprocal %21 {approx = true} : vector<4x8x1xf32> -> vector<4x8x1xf32>
    %23 = arith.mulf %21, %22 : vector<4x8x1xf32>
    %cst_13 = arith.constant 2.000000e+00 : f32
    %24 = vector.broadcast %cst_13 : f32 to vector<4x8x1xf32>
    %25 = arith.subf %24, %23 : vector<4x8x1xf32>
    %26 = arith.mulf %22, %25 : vector<4x8x1xf32>
    %27 = vector.broadcast %26 : vector<4x8x1xf32> to vector<4x8x128xf32>
    %28 = arith.mulf %19, %27 : vector<4x8x128xf32>
    %c0_14 = arith.constant 0 : index
    %c0_15 = arith.constant 0 : index
    %c0_16 = arith.constant 0 : index
    %29 = vector.load %arg4[%c0_14, %c0_15, %c0_16] : memref<4x128x128xf32, #tpu.memory_space<vmem>>, vector<4x128x128xf32>
    %cst_17 = arith.constant dense<0.000000e+00> : vector<4x8x128xf32>
    %30 = tpu.matmul %28, %29, %cst_17 {dimension_numbers = #tpu.dot_dimension_numbers<[2], [1], [1], [2], [0, 0, 0, 1, 1, 2], [0], [0]>} : vector<4x8x128xf32>, vector<4x128x128xf32>, vector<4x8x128xf32> -> vector<4x8x128xf32>
    %c0_18 = arith.constant 0 : index
    %c0_19 = arith.constant 0 : index
    %c0_20 = arith.constant 0 : index
    %31 = vector.load %arg6[%c0_18, %c0_19, %c0_20] : memref<4x8x128xf32, #tpu.memory_space<vmem>>, vector<4x8x128xf32>
    tpu.vector_store %arg6[%c0_18, %c0_19, %c0_20], %30 {strides = array<i32>} : memref<4x8x128xf32, #tpu.memory_space<vmem>>, vector<4x8x128xf32>,
    %c0_21 = arith.constant 0 : index
    %c0_22 = arith.constant 0 : index
    %c0_23 = arith.constant 0 : index
    %32 = vector.load %arg7[%c0_21, %c0_22, %c0_23] : memref<4x8x128xf32, #tpu.memory_space<vmem>>, vector<4x8x128xf32>
    tpu.vector_store %arg7[%c0_21, %c0_22, %c0_23], %28 {strides = array<i32>} : memref<4x8x128xf32, #tpu.memory_space<vmem>>, vector<4x8x128xf32>,
    return
  }
  func.func @transform_0(%arg0: i32, %arg1: i32) -> (i32, i32, i32) {
    %c0_i32 = arith.constant 0 : i32
    %c0_i32_0 = arith.constant 0 : i32
    return %arg0, %arg1, %c0_i32 : i32, i32, i32
  }
  func.func @transform_1(%arg0: i32, %arg1: i32) -> (i32, i32, i32) {
    %c0_i32 = arith.constant 0 : i32
    %c0_i32_0 = arith.constant 0 : i32
    %c0_i32_1 = arith.constant 0 : i32
    return %arg0, %c0_i32, %c0_i32_0 : i32, i32, i32
  }
  func.func @transform_2(%arg0: i32, %arg1: i32) -> (i32, i32, i32) {
    %c0_i32 = arith.constant 0 : i32
    %c0_i32_0 = arith.constant 0 : i32
    %c0_i32_1 = arith.constant 0 : i32
    return %arg0, %c0_i32, %c0_i32_0 : i32, i32, i32
  }
  func.func @transform_3(%arg0: i32, %arg1: i32) -> (i32, i32, i32) {
    %c0_i32 = arith.constant 0 : i32
    %c0_i32_0 = arith.constant 0 : i32
    return %arg0, %arg1, %c0_i32 : i32, i32, i32
  }
  func.func @transform_4(%arg0: i32, %arg1: i32) -> (i32, i32, i32) {
    %c0_i32 = arith.constant 0 : i32
    %c0_i32_0 = arith.constant 0 : i32
    return %arg0, %arg1, %c0_i32 : i32, i32, i32
  }
  func.func @transform_5(%arg0: i32, %arg1: i32) -> (i32, i32, i32) {
    %c0_i32 = arith.constant 0 : i32
    %c0_i32_0 = arith.constant 0 : i32
    return %arg0, %arg1, %c0_i32 : i32, i32, i32
  }
}

</mosaic_0001>

<bundles_post_ra>
// kernel: scaled_dot_product_attention.1
= control target key start
LH: loop header
LB: loop body
LE: loop exit
PB: predicated region body
PF: predicated region fallthrough
CT: control target
= control target key end

     0   :  { %11 = vsyncpa [#allocation3], 0  ;;  %s2823_s0 = inlined_call_operand.vmem [shape: f32[8,8,32], index: 0, kind: input, shape index: {}]   ;;  %s2824_s1 = inlined_call_operand.vmem [shape: f32[8,128,32], index: 1, kind: input, shape index: {}]   ;;  %s2825_s2 = inlined_call_operand.vmem [shape: f32[8,128,128], index: 2, kind: input, shape index: {}]   ;;  %s2826_s3 = inlined_call_operand.vmem [shape: s8[8,8,128], index: 3, kind: input, shape index: {}]   ;;  %s2827_s4 = inlined_call_operand.hbm [shape: f32[8,8,128], index: 4, kind: output, shape index: {0}]   ;;  %s2828_s5 = inlined_call_operand.hbm [shape: f32[8,8,128], index: 5, kind: output, shape index: {1}]  }
   0x1   :  { %13 = vsyncpa [#allocation3 + $0x1], 0 }
   0x2   :  { %14 = vsyncpa [#allocation5], 0 }
   0x3   :  { %16 = vsyncpa [#allocation5 + $0x1], 0  ;;  %s2262_s18 = smov 0   ;;  %s2264_s19 = smov 0  }
   0x4   :  { %s2266_s20 = smov 0   ;;  %s2268_s21 = smov 0  }
   0x5   :  { %s2270_s22 = smov 0   ;;  %s2272_s23 = smov 0  }
   0x6 LB: > { %s1523_s24 = sadd.s32 4294967295, %s2223_s23   ;;  %s1524_s25 = sadd.s32 4294967294, %s2223_s23   ;;  %s2223_s23 = sphi %s2272_s23, %s22_s23   ;;  %s2219_s22 = sphi %s2270_s22, %s2835_s22   ;;  %s2215_s21 = sphi %s2268_s21, %s2834_s21   ;;  %s2211_s20 = sphi %s2266_s20, %s2833_s20   ;;  %s2207_s19 = sphi %s2264_s19, %s2832_s19   ;;  %s2203_s18 = sphi %s2262_s18, %s2831_s18  }
   0x7   : > { %s34_s26 = sadd.s32 1, %s2219_s22  ;;  %s151_s27 = sadd.s32 1, %s2211_s20 }
   0x8   : > { %p36_p0 = scmp.ge.s32.totalorder %s34_s26, 2  ;;  %p161_p1 = scmp.ne.s32.totalorder %s2211_s20, %s2207_s19 }
   0x9   : > { %p162_p2 = scmp.eq.s32.totalorder %s1523_s24, 1  ;;  %p167_p3 = scmp.ne.s32.totalorder %s2207_s19, %s2203_s18 }
   0xa   : > { %s2837_s26 = smov (%p36_p0, %s34_s26), 0  ;;  %p168_p5 = scmp.eq.s32.totalorder %s1524_s25, 1 }
   0xb   : > { %p2302_p4 = por %p162_p2, %p161_p1  ;;  %s146_s29 = ssub.s32 %s2219_s22, %s2837_s26 }
   0xc   : > { %p1527_p6 = scmp.ge.s32.totalorder %s2223_s23, 1  ;;  %p149_p7 = scmp.eq.s32.totalorder %s146_s29, 0 }
   0xd   : > { %p2309_p8 = por %p168_p5, %p167_p3  ;;  %p258_p9 = scmp.lt.s32.totalorder %s2223_s23, 3 }
   0xe   : > { %s2315_s6 = scalar_select %p149_p7, %s2211_s20, %s151_s27  }
   0xf   : > { %p259_p10 = pnand %p1527_p6, %p258_p9 }
  0x10   : > { %s1530_s7 = sshll.u32 (!%p259_p10), %s2215_s21, 2  ;;  %s2228_s24 = smov (!%p259_p10), [#allocation4]  }
  0x11   : > { %262 = sbr.rel (%p259_p10) target bundleno = 875 (0x36b), region = 36  ;;  %p315_p11 = scmp.lt.s32.totalorder (!%p259_p10), %s1530_s7, 7 }
  0x16   : > { %v2225_v0 = vmov 0.0   ;;  %vm2226_vm0 = vmmov 0   ;;  %s2839_s7 = smov (!%p315_p11, %s1530_s7), 7  ;;  %vm422_vm1 = vcmask 261120  }
  0x17   : > { %1756 = vmatprep.subr.mxu0 %v2225_v0  ;;  %1791 = vmatprep.subr.mxu1 %v2225_v0  ;;  %s1616_s8 = sshll.u32 %s2839_s7, 7  ;;  %s1531_s12 = sshll.u32 %s2839_s7, 3 }
  0x18   : > { %1788 = vmatprep.mubr.msk.f32.mxu0 %vm2226_vm0, %v2225_v0  ;;  %1823 = vmatprep.mubr.msk.f32.mxu1 %vm2226_vm0, %v2225_v0  ;;  %s2332_s11 = scalar_lea.vmem %s2824_s1, %s1616_s8  ;;  %s2424_s15 = scalar_lea.vmem %s2823_s0, %s1531_s12 }
  0x19   : > { %v373_v1 = vld [vmem:[%s2332_s11 + $0x78] sm:$0xff]  ;;  %v372_v3 = vld [vmem:[%s2332_s11 + $0x70] sm:$0xff]  ;;  %v371_v5 = vld [vmem:[%s2332_s11 + $0x68] sm:$0xff]  ;;  %s1539_s16 = sshll.u32 %s2839_s7, 1  ;;  %s2567_s9 = scalar_lea.vmem %s2825_s2, %s1616_s8 }
  0x1a   : > { %v389_v2 = vld [vmem:[%s2332_s11 + $0xf8] sm:$0xff]  ;;  %1757 = vmatpush3.xpose.msk.msra.mxu0 %vm422_vm1, %v373_v1  ;;  %v388_v4 = vld [vmem:[%s2332_s11 + $0xf0] sm:$0xff]  ;;  %v387_v6 = vld [vmem:[%s2332_s11 + $0xe8] sm:$0xff]  ;;  %s344_s25 = scalar_lea.vmem %s2826_s3, %s1539_s16  ;;  %s2648_s7 = sand.u32 1, %s2207_s19  }
  0x1b   : > { %1792 = vmatpush3.xpose.msk.msra.mxu1 %vm422_vm1, %v389_v2  ;;  %1758 = vmatprep.subr.mxu0 %v2225_v0  ;;  %v370_v7 = vld [vmem:[%s2332_s11 + $0x60] sm:$0xff]  ;;  %v369_v9 = vld [vmem:[%s2332_s11 + $0x58] sm:$0xff]  ;;  %v368_v11 = vld [vmem:[%s2332_s11 + $0x50] sm:$0xff]  ;;  %s1528_s8 = sshll.u32 %s2648_s7, 5  ;;  %s1618_s12 = sshll.u32 %s2215_s21, 9 }
  0x1c   : > { %1793 = vmatprep.subr.mxu1 %v2225_v0  ;;  %v386_v8 = vld [vmem:[%s2332_s11 + $0xe0] sm:$0xff]  ;;  %v385_v10 = vld [vmem:[%s2332_s11 + $0xd8] sm:$0xff]  ;;  %v384_v12 = vld [vmem:[%s2332_s11 + $0xd0] sm:$0xff]  ;;  %s2656_s10 = scalar_lea.vmem [#allocation4], %s1528_s8  ;;  %s1344_s16 = scalar_lea.sflag [#allocation5], %s2648_s7 }
  0x1d   : > { %v367_v13 = vld [vmem:[%s2332_s11 + $0x48] sm:$0xff]  ;;  %v366_v15 = vld [vmem:[%s2332_s11 + $0x40] sm:$0xff]  ;;  %v365_v17 = vld [vmem:[%s2332_s11 + $0x38] sm:$0xff] }
  0x1e   : > { %1759 = vmatpush3.xpose.msk.msra.mxu0 %vm422_vm1, %v372_v3  ;;  %v383_v14 = vld [vmem:[%s2332_s11 + $0xc8] sm:$0xff]  ;;  %v382_v16 = vld [vmem:[%s2332_s11 + $0xc0] sm:$0xff]  ;;  %v381_v18 = vld [vmem:[%s2332_s11 + $0xb8] sm:$0xff] }
  0x1f   : > { %1794 = vmatpush3.xpose.msk.msra.mxu1 %vm422_vm1, %v388_v4  ;;  %1760 = vmatprep.subr.mxu0 %v2225_v0  ;;  %v364_v19 = vld [vmem:[%s2332_s11 + $0x30] sm:$0xff]  ;;  %v363_v21 = vld [vmem:[%s2332_s11 + $0x28] sm:$0xff]  ;;  %v362_v23 = vld [vmem:[%s2332_s11 + $0x20] sm:$0xff] }
  0x20   : > { %1795 = vmatprep.subr.mxu1 %v2225_v0  ;;  %v380_v20 = vld [vmem:[%s2332_s11 + $0xb0] sm:$0xff]  ;;  %v379_v22 = vld [vmem:[%s2332_s11 + $0xa8] sm:$0xff]  ;;  %v378_v24 = vld [vmem:[%s2332_s11 + $0xa0] sm:$0xff] }
  0x21   : > { %v361_v25 = vld [vmem:[%s2332_s11 + $0x18] sm:$0xff]  ;;  %v360_v27 = vld [vmem:[%s2332_s11 + $0x10] sm:$0xff]  ;;  %v359_v29 = vld [vmem:[%s2332_s11 + $0x8] sm:$0xff] }
  0x22   : > { %1761 = vmatpush3.xpose.msk.msra.mxu0 %vm422_vm1, %v371_v5  ;;  %v377_v26 = vld [vmem:[%s2332_s11 + $0x98] sm:$0xff]  ;;  %v376_v28 = vld [vmem:[%s2332_s11 + $0x90] sm:$0xff]  ;;  %v375_v30 = vld [vmem:[%s2332_s11 + $0x88] sm:$0xff] }
  0x23   : > { %1796 = vmatpush3.xpose.msk.msra.mxu1 %vm422_vm1, %v387_v6  ;;  %1762 = vmatprep.subr.mxu0 %v2225_v0  ;;  %v350_v31 = vld [vmem:[%s2424_s15] sm:$0xff]  ;;  %v351_v32 = vld [vmem:[%s2424_s15 + $0x8] sm:$0xff]  ;;  %v405_v37 = vld [vmem:[%s2332_s11 + $0x178] sm:$0xff] }
  0x24   : > { %1797 = vmatprep.subr.mxu1 %v2225_v0  ;;  %v358_v33 = vld [vmem:[%s2332_s11] sm:$0xff]  ;;  %v354_v35 = vmul.f32 0.17677669, %v350_v31  ;;  %v355_v36 = vmul.f32 0.17677669, %v351_v32  ;;  %v421_v38 = vld [vmem:[%s2332_s11 + $0x1f8] sm:$0xff] }
  0x25   : > { %v374_v34 = vld [vmem:[%s2332_s11 + $0x80] sm:$0xff]  ;;  %v404_v39 = vld [vmem:[%s2332_s11 + $0x170] sm:$0xff]  ;;  %v403_v41 = vld [vmem:[%s2332_s11 + $0x168] sm:$0xff] }
  0x26   : > { %1763 = vmatpush3.xpose.msk.msra.mxu0 %vm422_vm1, %v370_v7  ;;  %v420_v40 = vld [vmem:[%s2332_s11 + $0x1f0] sm:$0xff]  ;;  %v419_v42 = vld [vmem:[%s2332_s11 + $0x1e8] sm:$0xff]  ;;  %v402_v43 = vld [vmem:[%s2332_s11 + $0x160] sm:$0xff] }
  0x27   : > { %1798 = vmatpush3.xpose.msk.msra.mxu1 %vm422_vm1, %v386_v8  ;;  %1764 = vmatprep.subr.mxu0 %v2225_v0  ;;  %v418_v44 = vld [vmem:[%s2332_s11 + $0x1e0] sm:$0xff]  ;;  %v401_v45 = vld [vmem:[%s2332_s11 + $0x158] sm:$0xff]  ;;  %v400_v47 = vld [vmem:[%s2332_s11 + $0x150] sm:$0xff] }
  0x28   : > { %1799 = vmatprep.subr.mxu1 %v2225_v0  ;;  %v417_v46 = vld [vmem:[%s2332_s11 + $0x1d8] sm:$0xff]  ;;  %v416_v48 = vld [vmem:[%s2332_s11 + $0x1d0] sm:$0xff]  ;;  %v399_v49 = vld [vmem:[%s2332_s11 + $0x148] sm:$0xff] }
  0x29   : > { %v415_v50 = vld [vmem:[%s2332_s11 + $0x1c8] sm:$0xff]  ;;  %v398_v51 = vld [vmem:[%s2332_s11 + $0x140] sm:$0xff]  ;;  %v397_v53 = vld [vmem:[%s2332_s11 + $0x138] sm:$0xff] }
  0x2a   : > { %1765 = vmatpush3.xpose.msk.msra.mxu0 %vm422_vm1, %v369_v9  ;;  %v414_v52 = vld [vmem:[%s2332_s11 + $0x1c0] sm:$0xff]  ;;  %v413_v54 = vld [vmem:[%s2332_s11 + $0x1b8] sm:$0xff]  ;;  %v396_v55 = vld [vmem:[%s2332_s11 + $0x130] sm:$0xff] }
  0x2b   : > { %1800 = vmatpush3.xpose.msk.msra.mxu1 %vm422_vm1, %v385_v10  ;;  %1766 = vmatprep.subr.mxu0 %v2225_v0  ;;  %v412_v56 = vld [vmem:[%s2332_s11 + $0x1b0] sm:$0xff]  ;;  %v395_v57 = vld [vmem:[%s2332_s11 + $0x128] sm:$0xff]  ;;  %v394_v59 = vld [vmem:[%s2332_s11 + $0x120] sm:$0xff] }
  0x2c   : > { %1801 = vmatprep.subr.mxu1 %v2225_v0  ;;  %v411_v58 = vld [vmem:[%s2332_s11 + $0x1a8] sm:$0xff]  ;;  %v410_v60 = vld [vmem:[%s2332_s11 + $0x1a0] sm:$0xff]  ;;  %v393_v61 = vld [vmem:[%s2332_s11 + $0x118] sm:$0xff] }
  0x2d   : > { %v409_v62 = vld [vmem:[%s2332_s11 + $0x198] sm:$0xff]  ;;  %v392_v63 = vld [vmem:[%s2332_s11 + $0x110] sm:$0xff]  ;;  %v391_v2 = vld [vmem:[%s2332_s11 + $0x108] sm:$0xff] }
  0x2e   : > { %1767 = vmatpush3.xpose.msk.msra.mxu0 %vm422_vm1, %v368_v11  ;;  %v408_v1 = vld [vmem:[%s2332_s11 + $0x190] sm:$0xff]  ;;  %v407_v3 = vld [vmem:[%s2332_s11 + $0x188] sm:$0xff]  ;;  %v353_v5 = vld [vmem:[%s2424_s15 + $0x18] sm:$0xff] }
  0x2f   : > { %1802 = vmatpush3.xpose.msk.msra.mxu1 %vm422_vm1, %v384_v12  ;;  %1768 = vmatprep.subr.mxu0 %v2225_v0  ;;  %v352_v4 = vld [vmem:[%s2424_s15 + $0x10] sm:$0xff]  ;;  %v390_v6 = vld [vmem:[%s2332_s11 + $0x100] sm:$0xff]  ;;  %v357_v9 = vmul.f32 0.17677669, %v353_v5  ;;  %v2227_v12 = vmov 0   ;;  %v1009_v5 = vld [vmem:[%s2567_s9 + $0xb8] sm:$0xff]  ;;  %s2736_s15 = scalar_lea.hbm %s2828_s5, %s1618_s12 }
  0x30   : > { %1803 = vmatprep.subr.mxu1 %v2225_v0  ;;  %v406_v7 = vld [vmem:[%s2332_s11 + $0x180] sm:$0xff]  ;;  %v356_v8 = vmul.f32 0.17677669, %v352_v4  ;;  %v991_v4 = vld [vmem:[%s2567_s9 + $0x28] sm:$0xff]  ;;  %s1375_s11 = sshll.u32 %s2656_s10, 4  ;;  %s2738_s11 = int_to_ptr.vmem [resolvable:$true] %s1375_s11 }
  0x31   : > { %v907_v10 = vld [vmem:[%s344_s25] sm:$0x3]  ;;  %v908_v11 = vld [vmem:[%s344_s25 + $0x2] sm:$0x3]  ;;  %s2117_s17 = scalar_lea.vmem %s2738_s11, 512 }
  0x32   : > { %1769 = vmatpush3.xpose.msk.msra.mxu0 %vm422_vm1, %v367_v13  ;;  %vm911_vm2 = vnez %v907_v10  ;;  %vm912_vm3 = vnez %v908_v11  ;;  %v988_v10 = vld [vmem:[%s2567_s9 + $0x10] sm:$0xff]  ;;  %v1006_v11 = vld [vmem:[%s2567_s9 + $0xa0] sm:$0xff]  ;;  %p2118_p12 = scmp.ne.s32.totalorder %s2738_s11, %s2117_s17 }
  0x33   : > { %1804 = vmatpush3.xpose.msk.msra.mxu1 %vm422_vm1, %v383_v14  ;;  %1770 = vmatprep.subr.mxu0 %v2225_v0  ;;  %v915_v13 = vsel %vm911_vm2, 16843009, %v2227_v12  ;;  %v916_v14 = vsel %vm912_vm3, 16843009, %v2227_v12 }
  0x34   : > { %1805 = vmatprep.subr.mxu1 %v2225_v0  ;;  %p2119_p13 = pnand %p2118_p12, %p2302_p4 }
  0x36   : > { %1771 = vmatpush3.xpose.msk.msra.mxu0 %vm422_vm1, %v366_v15  ;;  %v931_v15 = vlaneseq  ;;  %p2120_p0 = pneg %p2119_p13 }
  0x37   : > { %1806 = vmatpush3.xpose.msk.msra.mxu1 %vm422_vm1, %v382_v16  ;;  %1772 = vmatprep.subr.mxu0 %v2225_v0  ;;  %v919_v16 = vunpack.c.0.s8 %v915_v13  ;;  %v1005_v13 = vld [vmem:[%s2567_s9 + $0x98] sm:$0xff] }
  0x38   : > { %1807 = vmatprep.subr.mxu1 %v2225_v0 }
  0x39   : > { %vm923_vm4 = vcmp.ne.s32.totalorder %v919_v16, 0  ;;  %v1003_v16 = vld [vmem:[%s2567_s9 + $0x88] sm:$0xff] }
  0x3a   : > { %1773 = vmatpush3.xpose.msk.msra.mxu0 %vm422_vm1, %v365_v17  ;;  %v920_v17 = vunpack.c.0.s8 %v916_v14  ;;  %v986_v14 = vld [vmem:[%s2567_s9] sm:$0xff] }
  0x3b   : > { %1808 = vmatpush3.xpose.msk.msra.mxu1 %vm422_vm1, %v381_v18  ;;  %1774 = vmatprep.subr.mxu0 %v2225_v0  ;;  %v932_v18 = vand.u32 127, %v931_v15  ;;  %v1004_v15 = vld [vmem:[%s2567_s9 + $0x90] sm:$0xff] }
  0x3c   : > { %1809 = vmatprep.subr.mxu1 %v2225_v0  ;;  %vm924_vm5 = vcmp.ne.s32.totalorder %v920_v17, 0  ;;  %v1002_v17 = vld [vmem:[%s2567_s9 + $0x80] sm:$0xff] }
  0x3d   : > { %vm933_vm6 = vcmp.ge.s32.totalorder %v932_v18, 8 }
  0x3e   : > { %1775 = vmatpush3.xpose.msk.msra.mxu0 %vm422_vm1, %v364_v19 }
  0x3f   : > { %1810 = vmatpush3.xpose.msk.msra.mxu1 %vm422_vm1, %v380_v20  ;;  %1776 = vmatprep.subr.mxu0 %v2225_v0 }
  0x40   : > { %1811 = vmatprep.subr.mxu1 %v2225_v0 }
  0x42   : > { %1777 = vmatpush3.xpose.msk.msra.mxu0 %vm422_vm1, %v363_v21 }
  0x43   : > { %1812 = vmatpush3.xpose.msk.msra.mxu1 %vm422_vm1, %v379_v22  ;;  %1778 = vmatprep.subr.mxu0 %v2225_v0 }
  0x44   : > { %1813 = vmatprep.subr.mxu1 %v2225_v0 }
  0x46   : > { %1779 = vmatpush3.xpose.msk.msra.mxu0 %vm422_vm1, %v362_v23 }
  0x47   : > { %1814 = vmatpush3.xpose.msk.msra.mxu1 %vm422_vm1, %v378_v24  ;;  %1780 = vmatprep.subr.mxu0 %v2225_v0 }
  0x48   : > { %1815 = vmatprep.subr.mxu1 %v2225_v0 }
  0x4a   : > { %1781 = vmatpush3.xpose.msk.msra.mxu0 %vm422_vm1, %v361_v25 }
  0x4b   : > { %1816 = vmatpush3.xpose.msk.msra.mxu1 %vm422_vm1, %v377_v26  ;;  %1782 = vmatprep.subr.mxu0 %v2225_v0 }
  0x4c   : > { %1817 = vmatprep.subr.mxu1 %v2225_v0 }
  0x4e   : > { %1783 = vmatpush3.xpose.msk.msra.mxu0 %vm422_vm1, %v360_v27  ;;  %v909_v27 = vld [vmem:[%s344_s25 + $0x4] sm:$0x3] }
  0x4f   : > { %1818 = vmatpush3.xpose.msk.msra.mxu1 %vm422_vm1, %v376_v28  ;;  %1784 = vmatprep.subr.mxu0 %v2225_v0  ;;  %v910_v28 = vld [vmem:[%s344_s25 + $0x6] sm:$0x3]  ;;  %vm913_vm7 = vnez %v909_v27  ;;  %s2121_s25 = sshll.u32 %s2228_s24, 4  ;;  %s2122_s25 = int_to_ptr.vmem [resolvable:$false] %s2121_s25 }
  0x50   : > { %1819 = vmatprep.subr.mxu1 %v2225_v0  ;;  %vm914_vm8 = vnez %v910_v28  ;;  %s2123_s27 = scalar_lea.vmem %s2122_s25, 1024  ;;  %p2124_p1 = scmp.lt.s32.totalorder %s2738_s11, %s2122_s25 }
  0x51   : > { %p2125_p2 = scmp.lt.s32.totalorder %s2123_s27, %s2117_s17 }
  0x52   : > { %1785 = vmatpush3.xpose.msk.msra.mxu0 %vm422_vm1, %v359_v29  ;;  %v917_v29 = vsel %vm913_vm7, 16843009, %v2227_v12 }
  0x53   : > { %1820 = vmatpush3.xpose.msk.msra.mxu1 %vm422_vm1, %v375_v30  ;;  %1786 = vmatprep.subr.mxu0 %v2225_v0  ;;  %v918_v30 = vsel %vm914_vm8, 16843009, %v2227_v12  ;;  %v921_v31 = vunpack.c.0.s8 %v917_v29  ;;  %v987_v12 = vld [vmem:[%s2567_s9 + $0x8] sm:$0xff]  ;;  %p2126_p3 = por %p2125_p2, %p2124_p1 }
  0x54   : > { %1821 = vmatprep.subr.mxu1 %v2225_v0  ;;  %v922_v32 = vunpack.c.0.s8 %v918_v30 }
  0x55   : > { %vm925_vm9 = vcmp.ne.s32.totalorder %v921_v31, 0  ;;  %p2127_p5 = pnand %p2126_p3, %p2120_p0 }
  0x56   : > { %1787 = vmatpush3.xpose.msk.msra.mxu0 %vm422_vm1, %v358_v33  ;;  %vm926_vm10 = vcmp.ne.s32.totalorder %v922_v32, 0 }
  0x57   : > { %1822 = vmatpush3.xpose.msk.msra.mxu1 %vm422_vm1, %v374_v34  ;;  %1826 = vmatprep.subr.mxu0 %v2225_v0 }
  0x58   : > { %1861 = vmatprep.subr.mxu1 %v2225_v0 }
  0x59   : > { %1789 = vmatmul.mubr.msk.f32.vlgmr.msra.gmra.mxu0 %vm422_vm1, %v354_v35 }
  0x5a   : > { %1824 = vmatmul.mubr.msk.f32.vlgmr.msra.gmra.mxu1 %vm422_vm1, %v355_v36  ;;  %1827 = vmatpush3.xpose.msk.msra.mxu0 %vm422_vm1, %v405_v37 }
  0x5b   : > { %1862 = vmatpush3.xpose.msk.msra.mxu1 %vm422_vm1, %v421_v38  ;;  %1828 = vmatprep.subr.mxu0 %v2225_v0 }
  0x5c   : > { %1863 = vmatprep.subr.mxu1 %v2225_v0  ;;  %1858 = vmatprep.mubr.msk.f32.mxu0 %vm2226_vm0, %v2225_v0 }
  0x5d   : > { %1893 = vmatprep.mubr.msk.f32.mxu1 %vm2226_vm0, %v2225_v0 }
  0x5e   : > { %1829 = vmatpush3.xpose.msk.msra.mxu0 %vm422_vm1, %v404_v39 }
  0x5f   : > { %1864 = vmatpush3.xpose.msk.msra.mxu1 %vm422_vm1, %v420_v40  ;;  %1830 = vmatprep.subr.mxu0 %v2225_v0 }
  0x60   : > { %1865 = vmatprep.subr.mxu1 %v2225_v0 }
  0x62   : > { %1831 = vmatpush3.xpose.msk.msra.mxu0 %vm422_vm1, %v403_v41  ;;  %v1001_v41 = vld [vmem:[%s2567_s9 + $0x78] sm:$0xff] }
  0x63   : > { %1866 = vmatpush3.xpose.msk.msra.mxu1 %vm422_vm1, %v419_v42  ;;  %1832 = vmatprep.subr.mxu0 %v2225_v0  ;;  %v1000_v42 = vld [vmem:[%s2567_s9 + $0x70] sm:$0xff] }
  0x64   : > { %1867 = vmatprep.subr.mxu1 %v2225_v0 }
  0x66   : > { %1833 = vmatpush3.xpose.msk.msra.mxu0 %vm422_vm1, %v402_v43  ;;  %v1017_v43 = vld [vmem:[%s2567_s9 + $0xf8] sm:$0xff] }
  0x67   : > { %1868 = vmatpush3.xpose.msk.msra.mxu1 %vm422_vm1, %v418_v44  ;;  %1834 = vmatprep.subr.mxu0 %v2225_v0  ;;  %v1016_v44 = vld [vmem:[%s2567_s9 + $0xf0] sm:$0xff] }
  0x68   : > { %1869 = vmatprep.subr.mxu1 %v2225_v0 }
  0x6a   : > { %1835 = vmatpush3.xpose.msk.msra.mxu0 %vm422_vm1, %v401_v45  ;;  %v999_v45 = vld [vmem:[%s2567_s9 + $0x68] sm:$0xff] }
  0x6b   : > { %1870 = vmatpush3.xpose.msk.msra.mxu1 %vm422_vm1, %v417_v46  ;;  %1836 = vmatprep.subr.mxu0 %v2225_v0  ;;  %v1015_v46 = vld [vmem:[%s2567_s9 + $0xe8] sm:$0xff] }
  0x6c   : > { %1871 = vmatprep.subr.mxu1 %v2225_v0 }
  0x6e   : > { %1837 = vmatpush3.xpose.msk.msra.mxu0 %vm422_vm1, %v400_v47  ;;  %v998_v47 = vld [vmem:[%s2567_s9 + $0x60] sm:$0xff] }
  0x6f   : > { %1872 = vmatpush3.xpose.msk.msra.mxu1 %vm422_vm1, %v416_v48  ;;  %1838 = vmatprep.subr.mxu0 %v2225_v0  ;;  %v997_v48 = vld [vmem:[%s2567_s9 + $0x58] sm:$0xff] }
  0x70   : > { %1873 = vmatprep.subr.mxu1 %v2225_v0 }
  0x72   : > { %1839 = vmatpush3.xpose.msk.msra.mxu0 %vm422_vm1, %v399_v49 }
  0x73   : > { %1874 = vmatpush3.xpose.msk.msra.mxu1 %vm422_vm1, %v415_v50  ;;  %1840 = vmatprep.subr.mxu0 %v2225_v0 }
  0x74   : > { %1875 = vmatprep.subr.mxu1 %v2225_v0 }
  0x76   : > { %1841 = vmatpush3.xpose.msk.msra.mxu0 %vm422_vm1, %v398_v51 }
  0x77   : > { %1876 = vmatpush3.xpose.msk.msra.mxu1 %vm422_vm1, %v414_v52  ;;  %1842 = vmatprep.subr.mxu0 %v2225_v0 }
  0x78   : > { %1877 = vmatprep.subr.mxu1 %v2225_v0 }
  0x7a   : > { %1843 = vmatpush3.xpose.msk.msra.mxu0 %vm422_vm1, %v397_v53 }
  0x7b   : > { %1878 = vmatpush3.xpose.msk.msra.mxu1 %vm422_vm1, %v413_v54  ;;  %1844 = vmatprep.subr.mxu0 %v2225_v0 }
  0x7c   : > { %1879 = vmatprep.subr.mxu1 %v2225_v0 }
  0x7e   : > { %1845 = vmatpush3.xpose.msk.msra.mxu0 %vm422_vm1, %v396_v55 }
  0x7f   : > { %1880 = vmatpush3.xpose.msk.msra.mxu1 %vm422_vm1, %v412_v56  ;;  %1846 = vmatprep.subr.mxu0 %v2225_v0 }
  0x80   : > { %1881 = vmatprep.subr.mxu1 %v2225_v0 }
  0x82   : > { %1847 = vmatpush3.xpose.msk.msra.mxu0 %vm422_vm1, %v395_v57  ;;  %v996_v57 = vld [vmem:[%s2567_s9 + $0x50] sm:$0xff] }
  0x83   : > { %1882 = vmatpush3.xpose.msk.msra.mxu1 %vm422_vm1, %v411_v58  ;;  %1848 = vmatprep.subr.mxu0 %v2225_v0  ;;  %v1014_v58 = vld [vmem:[%s2567_s9 + $0xe0] sm:$0xff] }
  0x84   : > { %1883 = vmatprep.subr.mxu1 %v2225_v0 }
  0x86   : > { %1849 = vmatpush3.xpose.msk.msra.mxu0 %vm422_vm1, %v394_v59  ;;  %v995_v59 = vld [vmem:[%s2567_s9 + $0x48] sm:$0xff] }
  0x87   : > { %1884 = vmatpush3.xpose.msk.msra.mxu1 %vm422_vm1, %v410_v60  ;;  %1850 = vmatprep.subr.mxu0 %v2225_v0  ;;  %v1013_v60 = vld [vmem:[%s2567_s9 + $0xd8] sm:$0xff] }
  0x88   : > { %1885 = vmatprep.subr.mxu1 %v2225_v0 }
  0x8a   : > { %1851 = vmatpush3.xpose.msk.msra.mxu0 %vm422_vm1, %v393_v61  ;;  %v994_v61 = vld [vmem:[%s2567_s9 + $0x40] sm:$0xff] }
  0x8b   : > { %1886 = vmatpush3.xpose.msk.msra.mxu1 %vm422_vm1, %v409_v62  ;;  %1852 = vmatprep.subr.mxu0 %v2225_v0  ;;  %v1012_v62 = vld [vmem:[%s2567_s9 + $0xd0] sm:$0xff] }
  0x8c   : > { %1887 = vmatprep.subr.mxu1 %v2225_v0 }
  0x8e   : > { %1853 = vmatpush3.xpose.msk.msra.mxu0 %vm422_vm1, %v392_v63  ;;  %v993_v63 = vld [vmem:[%s2567_s9 + $0x38] sm:$0xff] }
  0x8f   : > { %1888 = vmatpush3.xpose.msk.msra.mxu1 %vm422_vm1, %v408_v1  ;;  %1854 = vmatprep.subr.mxu0 %v2225_v0  ;;  %v1011_v1 = vld [vmem:[%s2567_s9 + $0xc8] sm:$0xff] }
  0x90   : > { %1889 = vmatprep.subr.mxu1 %v2225_v0 }
  0x92   : > { %1855 = vmatpush3.xpose.msk.msra.mxu0 %vm422_vm1, %v391_v2  ;;  %v992_v2 = vld [vmem:[%s2567_s9 + $0x30] sm:$0xff] }
  0x93   : > { %1890 = vmatpush3.xpose.msk.msra.mxu1 %vm422_vm1, %v407_v3  ;;  %1856 = vmatprep.subr.mxu0 %v2225_v0  ;;  %v1010_v3 = vld [vmem:[%s2567_s9 + $0xc0] sm:$0xff] }
  0x94   : > { %1891 = vmatprep.subr.mxu1 %v2225_v0 }
  0x96   : > { %1857 = vmatpush3.xpose.msk.msra.mxu0 %vm422_vm1, %v390_v6  ;;  %v990_v6 = vld [vmem:[%s2567_s9 + $0x20] sm:$0xff] }
  0x97   : > { %1892 = vmatpush3.xpose.msk.msra.mxu1 %vm422_vm1, %v406_v7  ;;  %1896 = vmatprep.subr.mxu0 %v2225_v0  ;;  %v1008_v7 = vld [vmem:[%s2567_s9 + $0xb0] sm:$0xff] }
  0x98   : > { %1931 = vmatprep.subr.mxu1 %v2225_v0 }
  0x99   : > { %1859 = vmatmul.mubr.msk.f32.vlgmr.msra.gmra.mxu0 %vm422_vm1, %v356_v8  ;;  %v989_v8 = vld [vmem:[%s2567_s9 + $0x18] sm:$0xff] }
  0x9a   : > { %1894 = vmatmul.mubr.msk.f32.vlgmr.msra.gmra.mxu1 %vm422_vm1, %v357_v9  ;;  %1928 = vmatprep.mubr.msk.f32.mxu0 %vm2226_vm0, %v2225_v0  ;;  %v1007_v9 = vld [vmem:[%s2567_s9 + $0xa8] sm:$0xff] }
  0x9b   : > { %1963 = vmatprep.mubr.msk.f32.mxu1 %vm2226_vm0, %v2225_v0  ;;  %1897 = vmatpush3.msra.mxu0 %v1001_v41  ;;  %v1049_v41 = vld [vmem:[%s2567_s9 + $0x1f8] sm:$0xff] }
  0x9c   : > { %1898 = vmatprep.subr.mxu0 %v2225_v0  ;;  %1932 = vmatpush3.msra.mxu1 %v1017_v43  ;;  %v1048_v43 = vld [vmem:[%s2567_s9 + $0x1f0] sm:$0xff] }
  0x9d   : > { %1899 = vmatpush3.msra.mxu0 %v1000_v42  ;;  %1933 = vmatprep.subr.mxu1 %v2225_v0  ;;  %v1030_v42 = vld [vmem:[%s2567_s9 + $0x160] sm:$0xff] }
  0x9e   : > { %1900 = vmatprep.subr.mxu0 %v2225_v0  ;;  %1934 = vmatpush3.msra.mxu1 %v1016_v44  ;;  %v1029_v44 = vld [vmem:[%s2567_s9 + $0x158] sm:$0xff] }
  0x9f   : > { %1901 = vmatpush3.msra.mxu0 %v999_v45  ;;  %1935 = vmatprep.subr.mxu1 %v2225_v0  ;;  %v1047_v45 = vld [vmem:[%s2567_s9 + $0x1e8] sm:$0xff] }
  0xa0   : > { %1902 = vmatprep.subr.mxu0 %v2225_v0  ;;  %1936 = vmatpush3.msra.mxu1 %v1015_v46  ;;  %v1028_v46 = vld [vmem:[%s2567_s9 + $0x150] sm:$0xff] }
  0xa1   : > { %1903 = vmatpush3.msra.mxu0 %v998_v47  ;;  %1937 = vmatprep.subr.mxu1 %v2225_v0  ;;  %v1046_v47 = vld [vmem:[%s2567_s9 + $0x1e0] sm:$0xff] }
  0xa2   : > { %1904 = vmatprep.subr.mxu0 %v2225_v0  ;;  %1938 = vmatpush3.msra.mxu1 %v1014_v58  ;;  %v1022_v58 = vld [vmem:[%s2567_s9 + $0x120] sm:$0xff] }
  0xa3   : > { %1905 = vmatpush3.msra.mxu0 %v997_v48  ;;  %1939 = vmatprep.subr.mxu1 %v2225_v0  ;;  %v1027_v48 = vld [vmem:[%s2567_s9 + $0x148] sm:$0xff] }
  0xa4   : > { %1906 = vmatprep.subr.mxu0 %v2225_v0  ;;  %1940 = vmatpush3.msra.mxu1 %v1013_v60  ;;  %v1021_v60 = vld [vmem:[%s2567_s9 + $0x118] sm:$0xff] }
  0xa5   : > { %1907 = vmatpush3.msra.mxu0 %v996_v57  ;;  %1941 = vmatprep.subr.mxu1 %v2225_v0  ;;  %v1041_v57 = vld [vmem:[%s2567_s9 + $0x1b8] sm:$0xff] }
  0xa6   : > { %1908 = vmatprep.subr.mxu0 %v2225_v0  ;;  %1942 = vmatpush3.msra.mxu1 %v1012_v62  ;;  %v1020_v62 = vld [vmem:[%s2567_s9 + $0x110] sm:$0xff] }
  0xa7   : > { %1909 = vmatpush3.msra.mxu0 %v995_v59  ;;  %1943 = vmatprep.subr.mxu1 %v2225_v0  ;;  %v1040_v59 = vld [vmem:[%s2567_s9 + $0x1b0] sm:$0xff] }
  0xa8   : > { %1910 = vmatprep.subr.mxu0 %v2225_v0  ;;  %1944 = vmatpush3.msra.mxu1 %v1011_v1  ;;  %v1019_v1 = vld [vmem:[%s2567_s9 + $0x108] sm:$0xff] }
  0xa9   : > { %1911 = vmatpush3.msra.mxu0 %v994_v61  ;;  %1945 = vmatprep.subr.mxu1 %v2225_v0  ;;  %v1039_v61 = vld [vmem:[%s2567_s9 + $0x1a8] sm:$0xff] }
  0xaa   : > { %1912 = vmatprep.subr.mxu0 %v2225_v0  ;;  %1946 = vmatpush3.msra.mxu1 %v1010_v3  ;;  %v1018_v3 = vld [vmem:[%s2567_s9 + $0x100] sm:$0xff] }
  0xab   : > { %1913 = vmatpush3.msra.mxu0 %v993_v63  ;;  %1947 = vmatprep.subr.mxu1 %v2225_v0  ;;  %v1038_v63 = vld [vmem:[%s2567_s9 + $0x1a0] sm:$0xff] }
  0xac   : > { %1914 = vmatprep.subr.mxu0 %v2225_v0  ;;  %1948 = vmatpush3.msra.mxu1 %v1009_v5  ;;  %v1035_v5 = vld [vmem:[%s2567_s9 + $0x188] sm:$0xff] }
  0xad   : > { %1915 = vmatpush3.msra.mxu0 %v992_v2  ;;  %1949 = vmatprep.subr.mxu1 %v2225_v0  ;;  %v1037_v2 = vld [vmem:[%s2567_s9 + $0x198] sm:$0xff] }
  0xae   : > { %1916 = vmatprep.subr.mxu0 %v2225_v0  ;;  %1950 = vmatpush3.msra.mxu1 %v1008_v7 }
  0xaf   : > { %1917 = vmatpush3.msra.mxu0 %v991_v4  ;;  %1951 = vmatprep.subr.mxu1 %v2225_v0  ;;  %v1036_v4 = vld [vmem:[%s2567_s9 + $0x190] sm:$0xff] }
  0xb0   : > { %1918 = vmatprep.subr.mxu0 %v2225_v0  ;;  %1952 = vmatpush3.msra.mxu1 %v1007_v9 }
  0xb1   : > { %1919 = vmatpush3.msra.mxu0 %v990_v6  ;;  %1953 = vmatprep.subr.mxu1 %v2225_v0  ;;  %v1034_v6 = vld [vmem:[%s2567_s9 + $0x180] sm:$0xff] }
  0xb2   : > { %1920 = vmatprep.subr.mxu0 %v2225_v0  ;;  %1954 = vmatpush3.msra.mxu1 %v1006_v11 }
  0xb3   : > { %1921 = vmatpush3.msra.mxu0 %v989_v8  ;;  %1955 = vmatprep.subr.mxu1 %v2225_v0 }
  0xb4   : > { %1922 = vmatprep.subr.mxu0 %v2225_v0  ;;  %1956 = vmatpush3.msra.mxu1 %v1005_v13 }
  0xb5   : > { %1923 = vmatpush3.msra.mxu0 %v988_v10  ;;  %1957 = vmatprep.subr.mxu1 %v2225_v0 }
  0xb6   : > { %1924 = vmatprep.subr.mxu0 %v2225_v0  ;;  %1958 = vmatpush3.msra.mxu1 %v1004_v15 }
  0xb7   : > { %1925 = vmatpush3.msra.mxu0 %v987_v12  ;;  %1959 = vmatprep.subr.mxu1 %v2225_v0 }
  0xb8   : > { %1926 = vmatprep.subr.mxu0 %v2225_v0  ;;  %1960 = vmatpush3.msra.mxu1 %v1003_v16 }
  0xb9   : > { %1927 = vmatpush3.msra.mxu0 %v986_v14  ;;  %1961 = vmatprep.subr.mxu1 %v2225_v0 }
  0xba   : > { %1966 = vmatprep.subr.mxu0 %v2225_v0  ;;  %1962 = vmatpush3.msra.mxu1 %v1002_v17 }
  0xbb   : > { %2001 = vmatprep.subr.mxu1 %v2225_v0 }
 0x119   : > { %v540_v19 = vpop.f32.mrf.mxu0 }
 0x11a   : > { %v661_v20 = vpop.f32.mrf.mxu1  ;;  %v927_v21 = vsel %vm923_vm4, -1e+09, %v540_v19 }
 0x11b   : > { %v928_v22 = vsel %vm924_vm5, -1e+09, %v661_v20  ;;  %v1790_v23 = vpop.f32.mrf.mxu0  ;;  %v934_v24 = vsel %vm933_vm6, -1e+30, %v927_v21 }
 0x11c   : > { %v1825_v25 = vpop.f32.mrf.mxu1  ;;  %938 = vmax.xlane.f32.xlu0 %v934_v24  ;;  %v935_v26 = vsel %vm933_vm6, -1e+30, %v928_v22 }
 0x120   : > { %940 = vmax.xlane.f32.xlu0 %v935_v26 }
 0x159   : > { %v782_v33 = vpop.f32.mrf.mxu0 }
 0x15a   : > { %v903_v34 = vpop.f32.mrf.mxu1  ;;  %v929_v35 = vsel %vm925_vm9, -1e+09, %v782_v33 }
 0x15b   : > { %v930_v36 = vsel %vm926_vm10, -1e+09, %v903_v34  ;;  %v1860_v37 = vpop.f32.mrf.mxu0  ;;  %v2555_v38 = vsel %vm933_vm6, -1e+30, %v929_v35 }
 0x15c   : > { %v1895_v39 = vpop.f32.mrf.mxu1  ;;  %942 = vmax.xlane.f32.xlu1 %v2555_v38  ;;  %v2559_v40 = vsel %vm933_vm6, -1e+30, %v930_v36  ;;  %v1033_v36 = vld [vmem:[%s2567_s9 + $0x178] sm:$0xff] }
 0x160   : > { %944 = vmax.xlane.f32.xlu1 %v2559_v40 }
 0x1a5   : > { %v939_v49 = vpop.xlane.xlu0 %938 }
 0x1a6   : > { %v946_v50 = vsub.f32 %v934_v24, %v939_v49  ;;  %v1045_v49 = vld [vmem:[%s2567_s9 + $0x1d8] sm:$0xff] }
 0x1a8   : > { %v950_v51 = vmul.f32 1.442695, %v946_v50  ;;  %v1026_v50 = vld [vmem:[%s2567_s9 + $0x140] sm:$0xff] }
 0x1a9   : > { %v941_v52 = vpop.xlane.xlu0 %940 }
 0x1aa   : > { %2101 = vpow2.f32 %v950_v51  ;;  %v947_v53 = vsub.f32 %v935_v26, %v941_v52  ;;  %v1044_v51 = vld [vmem:[%s2567_s9 + $0x1d0] sm:$0xff]  ;;  %v1025_v52 = vld [vmem:[%s2567_s9 + $0x138] sm:$0xff] }
 0x1ac   : > { %v952_v54 = vmul.f32 1.442695, %v947_v53  ;;  %v1043_v53 = vld [vmem:[%s2567_s9 + $0x1c8] sm:$0xff] }
 0x1ae   : > { %2103 = vpow2.f32 %v952_v54  ;;  %v1024_v54 = vld [vmem:[%s2567_s9 + $0x130] sm:$0xff] }
 0x1b7   : > { %v2585_v55 = vpop.eup %2101 }
 0x1b8   : > { %958 = vadd.xlane.f32.xlu0 %v2585_v55 }
 0x1bb   : > { %v2588_v56 = vpop.eup %2103 }
 0x1bc   : > { %960 = vadd.xlane.f32.xlu1 %v2588_v56 }
 0x1e5   : > { %v943_v18 = vpop.xlane.xlu1 %942 }
 0x1e6   : > { %v948_v19 = vsub.f32 %v2555_v38, %v943_v18  ;;  %v1032_v38 = vld [vmem:[%s2567_s9 + $0x170] sm:$0xff] }
 0x1e8   : > { %v954_v20 = vmul.f32 1.442695, %v948_v19 }
 0x1e9   : > { %v945_v21 = vpop.xlane.xlu1 %944 }
 0x1ea   : > { %2105 = vpow2.f32 %v954_v20  ;;  %v949_v22 = vsub.f32 %v2559_v40, %v945_v21  ;;  %v1031_v40 = vld [vmem:[%s2567_s9 + $0x168] sm:$0xff] }
 0x1ec   : > { %v956_v23 = vmul.f32 1.442695, %v949_v22 }
 0x1ee   : > { %2107 = vpow2.f32 %v956_v23 }
 0x1f7   : > { %v2641_v24 = vpop.eup %2105 }
 0x1f8   : > { %962 = vadd.xlane.f32.xlu0 %v2641_v24 }
 0x1fb   : > { %v2644_v25 = vpop.eup %2107 }
 0x1fc   : > { %964 = vadd.xlane.f32.xlu1 %v2644_v25 }
 0x241   : > { %v959_v26 = vpop.xlane.xlu0 %958 }
 0x242   : > { %2109 = vrcp.f32 %v959_v26 }
 0x245   : > { %v961_v27 = vpop.xlane.xlu1 %960 }
 0x246   : > { %2111 = vrcp.f32 %v961_v27 }
 0x24f   : > { %v2110_v28 = vpop.eup %2109 }
 0x250   : > { %v970_v29 = vmul.f32 %v2110_v28, %v959_v26 }
 0x252   : > { %v974_v30 = vsub.f32 2.0, %v970_v29 }
 0x253   : > { %v2112_v31 = vpop.eup %2111 }
 0x254   : > { %v978_v32 = vmul.f32 %v2110_v28, %v974_v30  ;;  %v971_v33 = vmul.f32 %v2112_v31, %v961_v27 }
 0x256   : > { %v982_v34 = vmul.f32 %v2585_v55, %v978_v32  ;;  %v975_v35 = vsub.f32 2.0, %v971_v33  ;;  %v1042_v55 = vld [vmem:[%s2567_s9 + $0x1c0] sm:$0xff] }
 0x258   : > { %v979_v37 = vmul.f32 %v2112_v31, %v975_v35  ;;  %1929 = vmatmul.mubr.f32.vlgmr.msra.gmra.mxu0 %v982_v34  ;;  %1334 = vst [vmem:[%s2656_s10] sm:$0xff] %v982_v34 }
 0x259   : > { %1967 = vmatpush3.msra.mxu0 %v1033_v36  ;;  %1998 = vmatprep.mubr.msk.f32.mxu0 %vm2226_vm0, %v2225_v0 }
 0x25a   : > { %v983_v39 = vmul.f32 %v2588_v56, %v979_v37  ;;  %1968 = vmatprep.subr.mxu0 %v2225_v0  ;;  %v1023_v56 = vld [vmem:[%s2567_s9 + $0x128] sm:$0xff] }
 0x25b   : > { %1969 = vmatpush3.msra.mxu0 %v1032_v38 }
 0x25c   : > { %1964 = vmatmul.mubr.f32.vlgmr.msra.gmra.mxu1 %v983_v39  ;;  %1970 = vmatprep.subr.mxu0 %v2225_v0  ;;  %1335 = vst [vmem:[%s2656_s10 + $0x8] sm:$0xff] %v983_v39 }
 0x25d   : > { %1971 = vmatpush3.msra.mxu0 %v1031_v40  ;;  %2002 = vmatpush3.msra.mxu1 %v1049_v41 }
 0x25e   : > { %1972 = vmatprep.subr.mxu0 %v2225_v0  ;;  %2003 = vmatprep.subr.mxu1 %v2225_v0 }
 0x25f   : > { %1973 = vmatpush3.msra.mxu0 %v1030_v42  ;;  %2004 = vmatpush3.msra.mxu1 %v1048_v43 }
 0x260   : > { %1974 = vmatprep.subr.mxu0 %v2225_v0  ;;  %2005 = vmatprep.subr.mxu1 %v2225_v0 }
 0x261   : > { %1975 = vmatpush3.msra.mxu0 %v1029_v44  ;;  %2006 = vmatpush3.msra.mxu1 %v1047_v45 }
 0x262   : > { %1976 = vmatprep.subr.mxu0 %v2225_v0  ;;  %2007 = vmatprep.subr.mxu1 %v2225_v0 }
 0x263   : > { %1977 = vmatpush3.msra.mxu0 %v1028_v46  ;;  %2008 = vmatpush3.msra.mxu1 %v1046_v47 }
 0x264   : > { %1978 = vmatprep.subr.mxu0 %v2225_v0  ;;  %2009 = vmatprep.subr.mxu1 %v2225_v0 }
 0x265   : > { %1979 = vmatpush3.msra.mxu0 %v1027_v48  ;;  %2010 = vmatpush3.msra.mxu1 %v1045_v49 }
 0x266   : > { %1980 = vmatprep.subr.mxu0 %v2225_v0  ;;  %2011 = vmatprep.subr.mxu1 %v2225_v0 }
 0x267   : > { %1981 = vmatpush3.msra.mxu0 %v1026_v50  ;;  %2012 = vmatpush3.msra.mxu1 %v1044_v51 }
 0x268   : > { %1982 = vmatprep.subr.mxu0 %v2225_v0  ;;  %2013 = vmatprep.subr.mxu1 %v2225_v0 }
 0x269   : > { %1983 = vmatpush3.msra.mxu0 %v1025_v52  ;;  %2014 = vmatpush3.msra.mxu1 %v1043_v53 }
 0x26a   : > { %1984 = vmatprep.subr.mxu0 %v2225_v0  ;;  %2015 = vmatprep.subr.mxu1 %v2225_v0 }
 0x26b   : > { %1985 = vmatpush3.msra.mxu0 %v1024_v54  ;;  %2016 = vmatpush3.msra.mxu1 %v1042_v55 }
 0x26c   : > { %1986 = vmatprep.subr.mxu0 %v2225_v0  ;;  %2017 = vmatprep.subr.mxu1 %v2225_v0 }
 0x26d   : > { %1987 = vmatpush3.msra.mxu0 %v1023_v56  ;;  %2018 = vmatpush3.msra.mxu1 %v1041_v57 }
 0x26e   : > { %1988 = vmatprep.subr.mxu0 %v2225_v0  ;;  %2019 = vmatprep.subr.mxu1 %v2225_v0 }
 0x26f   : > { %1989 = vmatpush3.msra.mxu0 %v1022_v58  ;;  %2020 = vmatpush3.msra.mxu1 %v1040_v59 }
 0x270   : > { %1990 = vmatprep.subr.mxu0 %v2225_v0  ;;  %2021 = vmatprep.subr.mxu1 %v2225_v0 }
 0x271   : > { %1991 = vmatpush3.msra.mxu0 %v1021_v60  ;;  %2022 = vmatpush3.msra.mxu1 %v1039_v61 }
 0x272   : > { %1992 = vmatprep.subr.mxu0 %v2225_v0  ;;  %2023 = vmatprep.subr.mxu1 %v2225_v0 }
 0x273   : > { %1993 = vmatpush3.msra.mxu0 %v1020_v62  ;;  %2024 = vmatpush3.msra.mxu1 %v1038_v63 }
 0x274   : > { %1994 = vmatprep.subr.mxu0 %v2225_v0  ;;  %2025 = vmatprep.subr.mxu1 %v2225_v0 }
 0x275   : > { %1995 = vmatpush3.msra.mxu0 %v1019_v1  ;;  %2026 = vmatpush3.msra.mxu1 %v1037_v2 }
 0x276   : > { %1996 = vmatprep.subr.mxu0 %v2225_v0  ;;  %2027 = vmatprep.subr.mxu1 %v2225_v0 }
 0x277   : > { %1997 = vmatpush3.msra.mxu0 %v1018_v3  ;;  %2028 = vmatpush3.msra.mxu1 %v1036_v4 }
 0x278   : > { %2029 = vmatprep.subr.mxu1 %v2225_v0  ;;  %2033 = vmatprep.mubr.msk.f32.mxu1 %vm2226_vm0, %v2225_v0 }
 0x279   : > { %2030 = vmatpush3.msra.mxu1 %v1035_v5 }
 0x27a   : > { %2031 = vmatprep.subr.mxu1 %v2225_v0 }
 0x27b   : > { %2032 = vmatpush3.msra.mxu1 %v1034_v6 }
 0x281   : > { %v963_v7 = vpop.xlane.xlu0 %962 }
 0x282   : > { %2113 = vrcp.f32 %v963_v7 }
 0x285   : > { %v965_v8 = vpop.xlane.xlu1 %964 }
 0x286   : > { %2115 = vrcp.f32 %v965_v8 }
 0x28f   : > { %v2114_v9 = vpop.eup %2113 }
 0x290   : > { %v972_v10 = vmul.f32 %v2114_v9, %v963_v7 }
 0x292   : > { %v976_v11 = vsub.f32 2.0, %v972_v10 }
 0x293   : > { %v2116_v12 = vpop.eup %2115 }
 0x294   : > { %v980_v13 = vmul.f32 %v2114_v9, %v976_v11  ;;  %v973_v14 = vmul.f32 %v2116_v12, %v965_v8 }
 0x296   : > { %v984_v15 = vmul.f32 %v2641_v24, %v980_v13  ;;  %v977_v0 = vsub.f32 2.0, %v973_v14 }
 0x298   : > { %1336 = vst [vmem:[%s2656_s10 + $0x10] sm:$0xff] %v984_v15  ;;  %v981_v16 = vmul.f32 %v2116_v12, %v977_v0  ;;  %1999 = vmatmul.mubr.f32.vlgmr.msra.gmra.mxu0 %v984_v15 }
 0x29a   : > { %v985_v17 = vmul.f32 %v2644_v25, %v981_v16 }
 0x29c   : > { %1337 = vst [vmem:[%s2656_s10 + $0x18] sm:$0xff] %v985_v17  ;;  %2034 = vmatmul.mubr.f32.vlgmr.msra.gmra.mxu1 %v985_v17 }
 0x29d   : > { %2130 = shalt.err (!%p2127_p5)
}
 0x29e   : > { %s2131_s29 = scalar_lea.hbm %s2736_s15, 512  ;;  %s2135_s13 = scalar_lea.hbm %s2828_s5, 1024 }
 0x29f   : > { %p2132_p6 = scmp.ne.s32.totalorder %s2736_s15, %s2131_s29  ;;  %p2136_p10 = scmp.lt.s32.totalorder %s2736_s15, %s2828_s5 }
 0x2a0   : > { %p2137_p11 = scmp.lt.s32.totalorder %s2135_s13, %s2131_s29 }
 0x2a1   : > { %p2133_p7 = pnand %p2132_p6, %p2302_p4 }
 0x2a2   : > { %p2138_p12 = por %p2137_p11, %p2136_p10 }
 0x2a3   : > { %p2134_p9 = pneg %p2133_p7 }
 0x2a5   : > { %p2139_p13 = pnand %p2138_p12, %p2134_p9 }
 0x2a7   : > { %2142 = shalt.err (!%p2139_p13)
}
 0x2a8   : > { %s2229_s17 = smov 128   ;;  %s2230_s25 = smov 8  }
 0x2a9   : > { %2037 = dma.vmem_to_hbm [thread:$0]  (%p2302_p4), %s2738_s11, 512, %s2736_s15, %s1344_s16, %s2229_s17, %s2229_s17, %s2230_s25  }
 0x2aa   : > { %s306_s27 = scalar_lea.vmem [#allocation2], %s1528_s8  ;;  %s2775_s8 = scalar_lea.hbm %s2827_s4, %s1618_s12 }
 0x2ab   : > { %s1358_s29 = sshll.u32 %s306_s27, 4  ;;  %s1339_s11 = scalar_lea.sflag [#allocation3], %s2648_s7  ;;  %s2768_s29 = int_to_ptr.vmem [resolvable:$true] %s1358_s29 }
 0x2ac   : > { %s2143_s15 = scalar_lea.vmem %s2768_s29, 512  ;;  %s2231_s16 = smov [#allocation2]  }
 0x2ad   : > { %p2144_p0 = scmp.ne.s32.totalorder %s2768_s29, %s2143_s15  ;;  %s2147_s13 = sshll.u32 %s2231_s16, 4  ;;  %s2148_s13 = int_to_ptr.vmem [resolvable:$false] %s2147_s13 }
 0x2ae   : > { %s2149_s21 = scalar_lea.vmem %s2148_s13, 1024  ;;  %p2150_p3 = scmp.lt.s32.totalorder %s2768_s29, %s2148_s13 }
 0x2af   : > { %p2145_p1 = pnand %p2144_p0, %p2302_p4  ;;  %p2151_p5 = scmp.lt.s32.totalorder %s2149_s21, %s2143_s15 }
 0x2b1   : > { %p2146_p2 = pneg %p2145_p1  ;;  %p2152_p6 = por %p2151_p5, %p2150_p3 }
 0x2b3   : > { %p2153_p7 = pnand %p2152_p6, %p2146_p2 }
 0x318   : > { %v1116_v18 = vpop.f32.mrf.mxu0 }
 0x319   : > { %1330 = vst [vmem:[%s306_s27] sm:$0xff] %v1116_v18 }
 0x31a   : > { %v1930_v19 = vpop.f32.mrf.mxu0 }
 0x31c   : > { %v1186_v20 = vpop.f32.mrf.mxu1 }
 0x31d   : > { %1331 = vst [vmem:[%s306_s27 + $0x8] sm:$0xff] %v1186_v20 }
 0x31e   : > { %v1965_v21 = vpop.f32.mrf.mxu1 }
 0x358   : > { %v1256_v22 = vpop.f32.mrf.mxu0 }
 0x359   : > { %1332 = vst [vmem:[%s306_s27 + $0x10] sm:$0xff] %v1256_v22 }
 0x35a   : > { %v2000_v23 = vpop.f32.mrf.mxu0 }
 0x35c   : > { %v1326_v24 = vpop.f32.mrf.mxu1 }
 0x35d   : > { %1333 = vst [vmem:[%s306_s27 + $0x18] sm:$0xff] %v1326_v24 }
 0x35e   : > { %v2035_v25 = vpop.f32.mrf.mxu1 }
 0x35f   : > { %2156 = shalt.err (!%p2153_p7)
}
 0x360   : > { %s2157_s12 = scalar_lea.hbm %s2775_s8, 512  ;;  %s2161_s24 = scalar_lea.hbm %s2827_s4, 1024 }
 0x361   : > { %p2158_p9 = scmp.ne.s32.totalorder %s2775_s8, %s2157_s12  ;;  %p2162_p12 = scmp.lt.s32.totalorder %s2775_s8, %s2827_s4 }
 0x362   : > { %p2163_p13 = scmp.lt.s32.totalorder %s2161_s24, %s2157_s12 }
 0x363   : > { %p2159_p10 = pnand %p2158_p9, %p2302_p4 }
 0x364   : > { %p2164_p0 = por %p2163_p13, %p2162_p12 }
 0x365   : > { %p2160_p11 = pneg %p2159_p10 }
 0x367   : > { %p2165_p1 = pnand %p2164_p0, %p2160_p11 }
 0x369   : > { %2168 = shalt.err (!%p2165_p1)
}
 0x36a   : > { %2036 = dma.vmem_to_hbm [thread:$0]  (%p2302_p4), %s2768_s29, 512, %s2775_s8, %s1339_s11, %s2229_s17, %s2229_s17, %s2230_s25  }
 0x36b PF: > { %p2047_p2 = scmp.ge.s32.totalorder %s2223_s23, 2  ;;  %s1390_s10 = sand.u32 1, %s2203_s18  }
 0x36c   : > { %s1391_s15 = scalar_lea.sflag [#allocation3], %s1390_s10 }
 0x36d   : > { %p2041_p3 = pnand %p2047_p2, %p2309_p8 }
 0x36f   : > { %p2042_p5 = pneg %p2041_p3 }
 0x371   : > { %2194 = dma.done.wait (%p2042_p5), %s1391_s15, 512  }
 0x372   : > { %2196 = vsyncadd (%p2042_p5), %s1391_s15, 4294966784  ;;  %s1400_s16 = scalar_lea.sflag [#allocation5], %s1390_s10 }
 0x373   : > { %2198 = dma.done.wait (%p2042_p5), %s1400_s16, 512  }
 0x374   : > { %2200 = vsyncadd (%p2042_p5), %s1400_s16, 4294966784  ;;  %s22_s23 = sadd.s32 1, %s2223_s23   ;;  %s2831_s18 = smov %s2207_s19 }
 0x375   : > { %p19_p6 = scmp.ge.s32.totalorder %s22_s23, 4   ;;  %s2832_s19 = smov %s2211_s20 }
 0x376   : > { %s2833_s20 = smov %s2315_s6  ;;  %s2834_s21 = smov %s2219_s22 }
 0x377   : > { %s2835_s22 = smov %s2837_s26  ;;  %21 = sbr.rel (!%p19_p6) target bundleno = 6 (0x6), region = 97 }
 0x37c   :  { %1405 = vsyncpa [#allocation3], 1 }
 0x37d   :  { %1407 = vsyncpa [#allocation3 + $0x1], 1 }
 0x37e   :  { %1408 = vsyncpa [#allocation5], 1 }
 0x37f   :  { %1410 = vsyncpa [#allocation5 + $0x1], 1 }

</bundles_post_ra>
